<compile_context>
chip_gen: v7x
topology: tpu7x:2x2x1
jax: 0.10.0
libtpu: 0.0.40
codegen_flags: <defaults>
</compile_context>

<pallas_src>
import jax
import jax.numpy as jnp
import numpy as np
from jax.experimental import pallas as pl
from jax.experimental.pallas import tpu as pltpu

# ------------------------------ config (small shapes) ------------------------------
BS, C_IN, SEQ_LEN, PRED_LEN = 2, 4, 32, 16          # batch, enc_in, seq_len, pred_len
D_MODEL, PATCH_LEN, STRIDE = 16, 8, 4
PADDING_PATCH = "end"
PATCH_NUM_IN = (SEQ_LEN - PATCH_LEN) // STRIDE + 1 + 1    # +1 for padding_patch == 'end'
PATCH_NUM_OUT = (PRED_LEN - PATCH_LEN) // STRIDE + 1 + 1  # +1 for padding_patch == 'end'
HALF_NF = D_MODEL * PATCH_NUM_OUT                          # per-branch flattened features
HEAD_NF = 2 * HALF_NF                                      # Flatten_Head input features
ROWS = BS * C_IN
EPS = 1e-5


# ------------------------------ fused Pallas kernel ------------------------------
def _fused_forward_kernel(x_ref, gamma_ref, beta_ref, sel_ref, wemb_ref, wproj_ref,
                          whead_ref, bhead_ref, out_ref, st_ref, sf_ref):
    # x_ref: [ROWS, SEQ_LEN], rows ordered (batch, var).  Everything stays on-chip.
    x = x_ref[...]
    mean = jnp.mean(x, axis=1, keepdims=True)                       # [ROWS, 1]
    cen = x - mean
    var = jnp.mean(cen * cen, axis=1, keepdims=True)                # unbiased=False
    std = jnp.sqrt(var + EPS)
    gamma = gamma_ref[...]                                          # [ROWS, 1]
    beta = beta_ref[...]                                            # [ROWS, 1]
    xn = cen / std * gamma + beta                                   # RevIN 'norm' (affine)

    # ReplicationPad1d((0, STRIDE)) + unfold(patch_len, stride) + permute, expressed
    # as one matmul with a constant 0/1 selection matrix (no gather HLO, no relayout):
    # p_wide[:, n*PATCH_LEN + p] = padded_x[:, n*STRIDE + p].
    p_wide = jnp.dot(xn, sel_ref[...], preferred_element_type=jnp.float32)

    # TODO(synk): PatchTST_MoE_cluster_time / _frequency (transformer + MoE + cluster
    # routing) source was not provided; deterministic stand-in backbones below.
    # Merged time||frequency patch embedding (block-diagonal over patches) + GELU.
    h = jax.nn.gelu(jnp.dot(p_wide, wemb_ref[...],
                            preferred_element_type=jnp.float32))    # [ROWS, NIN*2*DM]

    # Projection over the patch axis, scattered straight into Flatten_Head layout:
    # cols [0, HALF_NF) = x_time (feature d*NOUT+o), cols [HALF_NF, 2*HALF_NF) = x_freq.
    x_flat = jnp.dot(h, wproj_ref[...], preferred_element_type=jnp.float32)
    xt = x_flat[:, :HALF_NF]
    xf = x_flat[:, HALF_NF:]

    # Stand-in MoE/cluster scores: mean of squares of each backbone output.
    st_ref[...] = jnp.mean(jnp.mean(xt * xt, axis=1, keepdims=True), axis=0, keepdims=True)
    sf_ref[...] = jnp.mean(jnp.mean(xf * xf, axis=1, keepdims=True), axis=0, keepdims=True)

    # Flatten_Head: cat(-2) + flatten(-2) + Linear (dropout is a no-op in eval).
    y = jnp.dot(x_flat, whead_ref[...], preferred_element_type=jnp.float32) + bhead_ref[...]

    # RevIN 'denorm'.
    out_ref[...] = (y - beta) / (gamma + EPS * EPS) * std + mean


def fused_forward(xc, params):
    return pl.pallas_call(
        _fused_forward_kernel,
        out_shape=(
            jax.ShapeDtypeStruct((ROWS, PRED_LEN), jnp.float32),    # output slab
            jax.ShapeDtypeStruct((1, 1), jnp.float32),              # s_time
            jax.ShapeDtypeStruct((1, 1), jnp.float32),              # s_frequency
        ),
        grid=(1,),
        in_specs=[
            pl.BlockSpec((ROWS, SEQ_LEN), lambda i: (0, 0)),
            pl.BlockSpec((ROWS, 1), lambda i: (0, 0)),
            pl.BlockSpec((ROWS, 1), lambda i: (0, 0)),
            pl.BlockSpec((SEQ_LEN, PATCH_NUM_IN * PATCH_LEN), lambda i: (0, 0)),
            pl.BlockSpec((PATCH_NUM_IN * PATCH_LEN, PATCH_NUM_IN * 2 * D_MODEL),
                         lambda i: (0, 0)),
            pl.BlockSpec((PATCH_NUM_IN * 2 * D_MODEL, HEAD_NF), lambda i: (0, 0)),
            pl.BlockSpec((HEAD_NF, PRED_LEN), lambda i: (0, 0)),
            pl.BlockSpec((1, PRED_LEN), lambda i: (0, 0)),
        ],
        out_specs=(
            pl.BlockSpec((ROWS, PRED_LEN), lambda i: (0, 0)),
            pl.BlockSpec((1, 1), lambda i: (0, 0)),
            pl.BlockSpec((1, 1), lambda i: (0, 0)),
        ),
        compiler_params=pltpu.CompilerParams(dimension_semantics=("arbitrary",)),
    )(xc, params["gamma_rows"], params["beta_rows"], params["sel"],
      params["w_embblk"], params["w_projblk"], params["w_head_t"], params["head_b"])


def model_forward(x, params):
    # [bs, seq_len, c_in] -> [bs*c_in, seq_len] slab, rows ordered (batch, var).
    xc = jnp.transpose(x, (0, 2, 1)).reshape(ROWS, SEQ_LEN)
    out_slab, st2, sf2 = fused_forward(xc, params)
    output = jnp.transpose(out_slab.reshape(BS, C_IN, PRED_LEN), (0, 2, 1))
    return st2[0, 0], sf2[0, 0], output


# ------------------------------ one-time weight repacking ------------------------------
def pack_params(gamma, beta, wt_emb, wf_emb, wt_proj, wf_proj, w_head, b_head):
    """Repack weights once (outside the jitted forward) into kernel-friendly slabs."""
    gamma_rows = jnp.tile(gamma, BS).reshape(ROWS, 1)       # per (batch, var) row
    beta_rows = jnp.tile(beta, BS).reshape(ROWS, 1)

    # 0/1 selection matrix implementing ReplicationPad1d((0, STRIDE)) + unfold.
    src = np.minimum(
        np.arange(PATCH_NUM_IN)[:, None] * STRIDE + np.arange(PATCH_LEN)[None, :],
        SEQ_LEN - 1).reshape(-1)
    sel = np.zeros((SEQ_LEN, PATCH_NUM_IN * PATCH_LEN), np.float32)
    sel[src, np.arange(PATCH_NUM_IN * PATCH_LEN)] = 1.0

    # Merged time||frequency patch-embedding weight, block-diagonal over the patches.
    w_emb_cat = jnp.concatenate([wt_emb, wf_emb], axis=1)            # [PL, 2*DM]
    w_embblk = jnp.kron(jnp.eye(PATCH_NUM_IN, dtype=jnp.float32), w_emb_cat)

    # Patch-axis projection, scattered directly into Flatten_Head feature order
    # (feature f = d*PATCH_NUM_OUT + o; time block first, then frequency block).
    eye_dm = jnp.eye(D_MODEL, dtype=jnp.float32)
    t_blk = (wt_proj[:, None, None, :] * eye_dm[None, :, :, None]).reshape(
        PATCH_NUM_IN, D_MODEL, HALF_NF)
    f_blk = (wf_proj[:, None, None, :] * eye_dm[None, :, :, None]).reshape(
        PATCH_NUM_IN, D_MODEL, HALF_NF)
    zeros = jnp.zeros_like(t_blk)
    w_projblk = jnp.concatenate(
        [jnp.concatenate([t_blk, zeros], axis=2),
         jnp.concatenate([zeros, f_blk], axis=2)], axis=1
    ).reshape(PATCH_NUM_IN * 2 * D_MODEL, HEAD_NF)

    return {
        "gamma_rows": gamma_rows,
        "beta_rows": beta_rows,
        "sel": jnp.asarray(sel),
        "w_embblk": w_embblk,
        "w_projblk": w_projblk,
        "w_head_t": jnp.transpose(w_head),      # nn.Linear(HEAD_NF, PRED_LEN) weight.T
        "head_b": b_head.reshape(1, PRED_LEN),
    }


# ------------------------------ driver ------------------------------
if __name__ == "__main__":
    key = jax.random.PRNGKey(0)
    k = jax.random.split(key, 8)
    x = jax.random.normal(k[0], (BS, SEQ_LEN, C_IN), jnp.float32)

    gamma = jnp.ones((C_IN,), jnp.float32)          # RevIN affine weight
    beta = jnp.zeros((C_IN,), jnp.float32)          # RevIN affine bias
    wt_emb = 0.1 * jax.random.normal(k[1], (PATCH_LEN, D_MODEL), jnp.float32)
    wt_proj = 0.1 * jax.random.normal(k[2], (PATCH_NUM_IN, PATCH_NUM_OUT), jnp.float32)
    wf_emb = 0.1 * jax.random.normal(k[3], (PATCH_LEN, D_MODEL), jnp.float32)
    wf_proj = 0.1 * jax.random.normal(k[4], (PATCH_NUM_IN, PATCH_NUM_OUT), jnp.float32)
    # PyTorch nn.Linear(HEAD_NF, PRED_LEN): weight [PRED_LEN, HEAD_NF], bias [PRED_LEN].
    w_head = (1.0 / jnp.sqrt(HEAD_NF)) * jax.random.normal(
        k[5], (PRED_LEN, HEAD_NF), jnp.float32)
    b_head = (1.0 / jnp.sqrt(HEAD_NF)) * jax.random.normal(k[6], (PRED_LEN,), jnp.float32)

    params = pack_params(gamma, beta, wt_emb, wf_emb, wt_proj, wf_proj, w_head, b_head)

    s_t, s_f, out = jax.jit(model_forward)(x, params)
    jax.block_until_ready(out)
    assert out.shape == (BS, PRED_LEN, C_IN)
    assert s_t.shape == () and s_f.shape == ()
    print("KERNEL_OK")
</pallas_src>

<mosaic_0001>
module attributes {stable_mosaic.version = 11 : i64} {
  func.func @_fused_forward_kernel(%arg0: i32, %arg1: memref<8x32xf32, #tpu.memory_space<vmem>>, %arg2: memref<8x1xf32, #tpu.memory_space<vmem>>, %arg3: memref<8x1xf32, #tpu.memory_space<vmem>>, %arg4: memref<32x64xf32, #tpu.memory_space<vmem>>, %arg5: memref<64x256xf32, #tpu.memory_space<vmem>>, %arg6: memref<256x128xf32, #tpu.memory_space<vmem>>, %arg7: memref<128x16xf32, #tpu.memory_space<vmem>>, %arg8: memref<1x16xf32, #tpu.memory_space<vmem>>, %arg9: memref<8x16xf32, #tpu.memory_space<vmem>>, %arg10: memref<1x1xf32, #tpu.memory_space<vmem>>, %arg11: memref<1x1xf32, #tpu.memory_space<vmem>>) attributes {dimension_semantics = [#tpu.dimension_semantics<arbitrary>], iteration_bounds = array<i64: 1>, scalar_prefetch = 0 : i64, scratch_operands = 0 : i64, tpu.core_type = #tpu.core_type<tc>, window_params = [{pipeline_mode = #tpu.pipeline_mode<synchronous>, transform_indices = @transform_0, window_bounds = array<i64: 8, 32>}, {pipeline_mode = #tpu.pipeline_mode<synchronous>, transform_indices = @transform_1, window_bounds = array<i64: 8, 1>}, {pipeline_mode = #tpu.pipeline_mode<synchronous>, transform_indices = @transform_2, window_bounds = array<i64: 8, 1>}, {pipeline_mode = #tpu.pipeline_mode<synchronous>, transform_indices = @transform_3, window_bounds = array<i64: 32, 64>}, {pipeline_mode = #tpu.pipeline_mode<synchronous>, transform_indices = @transform_4, window_bounds = array<i64: 64, 256>}, {pipeline_mode = #tpu.pipeline_mode<synchronous>, transform_indices = @transform_5, window_bounds = array<i64: 256, 128>}, {pipeline_mode = #tpu.pipeline_mode<synchronous>, transform_indices = @transform_6, window_bounds = array<i64: 128, 16>}, {pipeline_mode = #tpu.pipeline_mode<synchronous>, transform_indices = @transform_7, window_bounds = array<i64: 1, 16>}, {pipeline_mode = #tpu.pipeline_mode<synchronous>, transform_indices = @transform_8, window_bounds = array<i64: 8, 16>}, {pipeline_mode = #tpu.pipeline_mode<synchronous>, transform_indices = @transform_9, window_bounds = array<i64: 1, 1>}, {pipeline_mode = #tpu.pipeline_mode<synchronous>, transform_indices = @transform_10, window_bounds = array<i64: 1, 1>}]} {
    %c0 = arith.constant 0 : index
    %c0_0 = arith.constant 0 : index
    %0 = vector.load %arg1[%c0, %c0_0] : memref<8x32xf32, #tpu.memory_space<vmem>>, vector<8x32xf32>
    %cst = arith.constant dense<0.000000e+00> : vector<8xf32>
    %1 = vector.multi_reduction <add>, %0, %cst [1] : vector<8x32xf32> to vector<8xf32>
    %2 = vector.shape_cast %1 : vector<8xf32> to vector<8x1xf32>
    %cst_1 = arith.constant 3.200000e+01 : f32
    %3 = vector.broadcast %cst_1 : f32 to vector<8x1xf32>
    %4 = arith.divf %2, %3 : vector<8x1xf32>
    %5 = vector.broadcast %4 : vector<8x1xf32> to vector<8x32xf32>
    %6 = arith.subf %0, %5 : vector<8x32xf32>
    %7 = arith.mulf %6, %6 : vector<8x32xf32>
    %cst_2 = arith.constant dense<0.000000e+00> : vector<8xf32>
    %8 = vector.multi_reduction <add>, %7, %cst_2 [1] : vector<8x32xf32> to vector<8xf32>
    %9 = vector.shape_cast %8 : vector<8xf32> to vector<8x1xf32>
    %cst_3 = arith.constant 3.200000e+01 : f32
    %10 = vector.broadcast %cst_3 : f32 to vector<8x1xf32>
    %11 = arith.divf %9, %10 : vector<8x1xf32>
    %cst_4 = arith.constant 9.99999974E-6 : f32
    %12 = vector.broadcast %cst_4 : f32 to vector<8x1xf32>
    %13 = arith.addf %11, %12 : vector<8x1xf32>
    %14 = math.sqrt %13 : vector<8x1xf32>
    %c0_5 = arith.constant 0 : index
    %c0_6 = arith.constant 0 : index
    %15 = vector.load %arg2[%c0_5, %c0_6] : memref<8x1xf32, #tpu.memory_space<vmem>>, vector<8x1xf32>
    %c0_7 = arith.constant 0 : index
    %c0_8 = arith.constant 0 : index
    %16 = vector.load %arg3[%c0_7, %c0_8] : memref<8x1xf32, #tpu.memory_space<vmem>>, vector<8x1xf32>
    %17 = vector.broadcast %14 : vector<8x1xf32> to vector<8x32xf32>
    %18 = arith.divf %6, %17 : vector<8x32xf32>
    %19 = vector.broadcast %15 : vector<8x1xf32> to vector<8x32xf32>
    %20 = arith.mulf %18, %19 : vector<8x32xf32>
    %21 = vector.broadcast %16 : vector<8x1xf32> to vector<8x32xf32>
    %22 = arith.addf %20, %21 : vector<8x32xf32>
    %c0_9 = arith.constant 0 : index
    %c0_10 = arith.constant 0 : index
    %23 = vector.load %arg4[%c0_9, %c0_10] : memref<32x64xf32, #tpu.memory_space<vmem>>, vector<32x64xf32>
    %cst_11 = arith.constant dense<0.000000e+00> : vector<8x64xf32>
    %24 = tpu.matmul %22, %23, %cst_11 {dimension_numbers = #tpu.dot_dimension_numbers<[1], [0], [0], [1], [0, 0, 1, 1], [], []>} : vector<8x32xf32>, vector<32x64xf32>, vector<8x64xf32> -> vector<8x64xf32>
    %c0_12 = arith.constant 0 : index
    %c0_13 = arith.constant 0 : index
    %25 = vector.load %arg5[%c0_12, %c0_13] : memref<64x256xf32, #tpu.memory_space<vmem>>, vector<64x256xf32>
    %cst_14 = arith.constant dense<0.000000e+00> : vector<8x256xf32>
    %26 = tpu.matmul %24, %25, %cst_14 {dimension_numbers = #tpu.dot_dimension_numbers<[1], [0], [0], [1], [0, 0, 1, 1], [], []>} : vector<8x64xf32>, vector<64x256xf32>, vector<8x256xf32> -> vector<8x256xf32>
    %27 = arith.mulf %26, %26 : vector<8x256xf32>
    %28 = arith.mulf %26, %27 : vector<8x256xf32>
    %cst_15 = arith.constant 4.471500e-02 : f32
    %29 = vector.broadcast %cst_15 : f32 to vector<8x256xf32>
    %30 = arith.mulf %29, %28 : vector<8x256xf32>
    %31 = arith.addf %26, %30 : vector<8x256xf32>
    %cst_16 = arith.constant 0.797884583 : f32
    %32 = vector.broadcast %cst_16 : f32 to vector<8x256xf32>
    %33 = arith.mulf %32, %31 : vector<8x256xf32>
    %34 = math.tanh %33 : vector<8x256xf32>
    %cst_17 = arith.constant 1.000000e+00 : f32
    %35 = vector.broadcast %cst_17 : f32 to vector<8x256xf32>
    %36 = arith.addf %35, %34 : vector<8x256xf32>
    %cst_18 = arith.constant 5.000000e-01 : f32
    %37 = vector.broadcast %cst_18 : f32 to vector<8x256xf32>
    %38 = arith.mulf %37, %36 : vector<8x256xf32>
    %39 = arith.mulf %26, %38 : vector<8x256xf32>
    %c0_19 = arith.constant 0 : index
    %c0_20 = arith.constant 0 : index
    %40 = vector.load %arg6[%c0_19, %c0_20] : memref<256x128xf32, #tpu.memory_space<vmem>>, vector<256x128xf32>
    %cst_21 = arith.constant dense<0.000000e+00> : vector<8x128xf32>
    %41 = tpu.matmul %39, %40, %cst_21 {dimension_numbers = #tpu.dot_dimension_numbers<[1], [0], [0], [1], [0, 0, 1, 1], [], []>} : vector<8x256xf32>, vector<256x128xf32>, vector<8x128xf32> -> vector<8x128xf32>
    %42 = vector.extract_strided_slice %41 {offsets = [0, 0], sizes = [8, 64], strides = [1, 1]} : vector<8x128xf32> to vector<8x64xf32>
    %43 = vector.extract_strided_slice %41 {offsets = [0, 64], sizes = [8, 64], strides = [1, 1]} : vector<8x128xf32> to vector<8x64xf32>
    %44 = arith.mulf %42, %42 : vector<8x64xf32>
    %cst_22 = arith.constant dense<0.000000e+00> : vector<8xf32>
    %45 = vector.multi_reduction <add>, %44, %cst_22 [1] : vector<8x64xf32> to vector<8xf32>
    %46 = vector.shape_cast %45 : vector<8xf32> to vector<8x1xf32>
    %cst_23 = arith.constant 6.400000e+01 : f32
    %47 = vector.broadcast %cst_23 : f32 to vector<8x1xf32>
    %48 = arith.divf %46, %47 : vector<8x1xf32>
    %cst_24 = arith.constant dense<0.000000e+00> : vector<1xf32>
    %49 = vector.multi_reduction <add>, %48, %cst_24 [0] : vector<8x1xf32> to vector<1xf32>
    %50 = vector.shape_cast %49 : vector<1xf32> to vector<1x1xf32>
    %cst_25 = arith.constant 8.000000e+00 : f32
    %51 = vector.broadcast %cst_25 : f32 to vector<1x1xf32>
    %52 = arith.divf %50, %51 : vector<1x1xf32>
    %c0_26 = arith.constant 0 : index
    %c0_27 = arith.constant 0 : index
    %53 = vector.load %arg10[%c0_26, %c0_27] : memref<1x1xf32, #tpu.memory_space<vmem>>, vector<1x1xf32>
    tpu.vector_store %arg10[%c0_26, %c0_27], %52 {strides = array<i32>} : memref<1x1xf32, #tpu.memory_space<vmem>>, vector<1x1xf32>,
    %54 = arith.mulf %43, %43 : vector<8x64xf32>
    %cst_28 = arith.constant dense<0.000000e+00> : vector<8xf32>
    %55 = vector.multi_reduction <add>, %54, %cst_28 [1] : vector<8x64xf32> to vector<8xf32>
    %56 = vector.shape_cast %55 : vector<8xf32> to vector<8x1xf32>
    %cst_29 = arith.constant 6.400000e+01 : f32
    %57 = vector.broadcast %cst_29 : f32 to vector<8x1xf32>
    %58 = arith.divf %56, %57 : vector<8x1xf32>
    %cst_30 = arith.constant dense<0.000000e+00> : vector<1xf32>
    %59 = vector.multi_reduction <add>, %58, %cst_30 [0] : vector<8x1xf32> to vector<1xf32>
    %60 = vector.shape_cast %59 : vector<1xf32> to vector<1x1xf32>
    %cst_31 = arith.constant 8.000000e+00 : f32
    %61 = vector.broadcast %cst_31 : f32 to vector<1x1xf32>
    %62 = arith.divf %60, %61 : vector<1x1xf32>
    %c0_32 = arith.constant 0 : index
    %c0_33 = arith.constant 0 : index
    %63 = vector.load %arg11[%c0_32, %c0_33] : memref<1x1xf32, #tpu.memory_space<vmem>>, vector<1x1xf32>
    tpu.vector_store %arg11[%c0_32, %c0_33], %62 {strides = array<i32>} : memref<1x1xf32, #tpu.memory_space<vmem>>, vector<1x1xf32>,
    %c0_34 = arith.constant 0 : index
    %c0_35 = arith.constant 0 : index
    %64 = vector.load %arg7[%c0_34, %c0_35] : memref<128x16xf32, #tpu.memory_space<vmem>>, vector<128x16xf32>
    %cst_36 = arith.constant dense<0.000000e+00> : vector<8x16xf32>
    %65 = tpu.matmul %41, %64, %cst_36 {dimension_numbers = #tpu.dot_dimension_numbers<[1], [0], [0], [1], [0, 0, 1, 1], [], []>} : vector<8x128xf32>, vector<128x16xf32>, vector<8x16xf32> -> vector<8x16xf32>
    %c0_37 = arith.constant 0 : index
    %c0_38 = arith.constant 0 : index
    %66 = vector.load %arg8[%c0_37, %c0_38] : memref<1x16xf32, #tpu.memory_space<vmem>>, vector<1x16xf32>
    %67 = vector.broadcast %66 : vector<1x16xf32> to vector<8x16xf32>
    %68 = arith.addf %65, %67 : vector<8x16xf32>
    %69 = vector.broadcast %16 : vector<8x1xf32> to vector<8x16xf32>
    %70 = arith.subf %68, %69 : vector<8x16xf32>
    %cst_39 = arith.constant 1.000000e-10 : f32
    %71 = vector.broadcast %cst_39 : f32 to vector<8x1xf32>
    %72 = arith.addf %15, %71 : vector<8x1xf32>
    %73 = vector.broadcast %72 : vector<8x1xf32> to vector<8x16xf32>
    %74 = arith.divf %70, %73 : vector<8x16xf32>
    %75 = vector.broadcast %14 : vector<8x1xf32> to vector<8x16xf32>
    %76 = arith.mulf %74, %75 : vector<8x16xf32>
    %77 = vector.broadcast %4 : vector<8x1xf32> to vector<8x16xf32>
    %78 = arith.addf %76, %77 : vector<8x16xf32>
    %c0_40 = arith.constant 0 : index
    %c0_41 = arith.constant 0 : index
    %79 = vector.load %arg9[%c0_40, %c0_41] : memref<8x16xf32, #tpu.memory_space<vmem>>, vector<8x16xf32>
    tpu.vector_store %arg9[%c0_40, %c0_41], %78 {strides = array<i32>} : memref<8x16xf32, #tpu.memory_space<vmem>>, vector<8x16xf32>,
    return
  }
  func.func @transform_0(%arg0: i32) -> (i32, i32) {
    %c0_i32 = arith.constant 0 : i32
    %c0_i32_0 = arith.constant 0 : i32
    %c0_i32_1 = arith.constant 0 : i32
    return %c0_i32, %c0_i32_0 : i32, i32
  }
  func.func @transform_1(%arg0: i32) -> (i32, i32) {
    %c0_i32 = arith.constant 0 : i32
    %c0_i32_0 = arith.constant 0 : i32
    %c0_i32_1 = arith.constant 0 : i32
    return %c0_i32, %c0_i32_0 : i32, i32
  }
  func.func @transform_2(%arg0: i32) -> (i32, i32) {
    %c0_i32 = arith.constant 0 : i32
    %c0_i32_0 = arith.constant 0 : i32
    %c0_i32_1 = arith.constant 0 : i32
    return %c0_i32, %c0_i32_0 : i32, i32
  }
  func.func @transform_3(%arg0: i32) -> (i32, i32) {
    %c0_i32 = arith.constant 0 : i32
    %c0_i32_0 = arith.constant 0 : i32
    %c0_i32_1 = arith.constant 0 : i32
    return %c0_i32, %c0_i32_0 : i32, i32
  }
  func.func @transform_4(%arg0: i32) -> (i32, i32) {
    %c0_i32 = arith.constant 0 : i32
    %c0_i32_0 = arith.constant 0 : i32
    %c0_i32_1 = arith.constant 0 : i32
    return %c0_i32, %c0_i32_0 : i32, i32
  }
  func.func @transform_5(%arg0: i32) -> (i32, i32) {
    %c0_i32 = arith.constant 0 : i32
    %c0_i32_0 = arith.constant 0 : i32
    %c0_i32_1 = arith.constant 0 : i32
    return %c0_i32, %c0_i32_0 : i32, i32
  }
  func.func @transform_6(%arg0: i32) -> (i32, i32) {
    %c0_i32 = arith.constant 0 : i32
    %c0_i32_0 = arith.constant 0 : i32
    %c0_i32_1 = arith.constant 0 : i32
    return %c0_i32, %c0_i32_0 : i32, i32
  }
  func.func @transform_7(%arg0: i32) -> (i32, i32) {
    %c0_i32 = arith.constant 0 : i32
    %c0_i32_0 = arith.constant 0 : i32
    %c0_i32_1 = arith.constant 0 : i32
    return %c0_i32, %c0_i32_0 : i32, i32
  }
  func.func @transform_8(%arg0: i32) -> (i32, i32) {
    %c0_i32 = arith.constant 0 : i32
    %c0_i32_0 = arith.constant 0 : i32
    %c0_i32_1 = arith.constant 0 : i32
    return %c0_i32, %c0_i32_0 : i32, i32
  }
  func.func @transform_9(%arg0: i32) -> (i32, i32) {
    %c0_i32 = arith.constant 0 : i32
    %c0_i32_0 = arith.constant 0 : i32
    %c0_i32_1 = arith.constant 0 : i32
    return %c0_i32, %c0_i32_0 : i32, i32
  }
  func.func @transform_10(%arg0: i32) -> (i32, i32) {
    %c0_i32 = arith.constant 0 : i32
    %c0_i32_0 = arith.constant 0 : i32
    %c0_i32_1 = arith.constant 0 : i32
    return %c0_i32, %c0_i32_0 : i32, i32
  }
}

</mosaic_0001>

<bundles_post_ra>
// kernel: model_forward.1
= control target key start
LH: loop header
LB: loop body
LE: loop exit
PB: predicated region body
PF: predicated region fallthrough
CT: control target
= control target key end

     0   :  { %16 = vsyncpa [#allocation3], 0  ;;  %s1132_s0 = inlined_call_operand.vmem [shape: f32[8,32], index: 0, kind: input, shape index: {}]   ;;  %s1133_s1 = inlined_call_operand.vmem [shape: f32[8,1], index: 1, kind: input, shape index: {}]   ;;  %s1134_s2 = inlined_call_operand.vmem [shape: f32[8,1], index: 2, kind: input, shape index: {}]   ;;  %s1135_s3 = inlined_call_operand.vmem [shape: f32[32,64], index: 3, kind: input, shape index: {}]   ;;  %s1136_s4 = inlined_call_operand.vmem [shape: f32[64,256], index: 4, kind: input, shape index: {}]   ;;  %s1137_s5 = inlined_call_operand.hbm [shape: f32[256,128], index: 5, kind: input, shape index: {}]   ;;  %s1138_s6 = inlined_call_operand.vmem [shape: f32[128,16], index: 6, kind: input, shape index: {}]   ;;  %s1139_s7 = inlined_call_operand.vmem [shape: f32[1,16], index: 7, kind: input, shape index: {}]   ;;  %s1140_s8 = inlined_call_operand.hbm [shape: f32[8,16], index: 8, kind: output, shape index: {0}]   ;;  %s1141_s9 = inlined_call_operand.hbm [shape: f32[1,1], index: 9, kind: output, shape index: {1}]   ;;  %s1142_s10 = inlined_call_operand.hbm [shape: f32[1,1], index: 10, kind: output, shape index: {2}]  }
   0x1   :  { %17 = vsyncpa [#allocation4], 0 }
   0x2   :  { %18 = vsyncpa [#allocation7], 0  ;;  %s854_s13 = smov [#allocation2]   ;;  %s760_s17 = scalar_lea.hbm %s1137_s5, 4096 }
   0x3   :  { %s34_s14 = sshll.u32 %s854_s13, 4  ;;  %p761_p0 = scmp.ne.s32.totalorder %s1137_s5, %s760_s17  ;;  %s35_s14 = int_to_ptr.vmem [resolvable:$true] %s34_s14 }
   0x4   :  { %p764_p1 = scmp.lt.u32.totalorder %s760_s17, %s1137_s5 }
   0x6   :  { %p766_p2 = pnand %p764_p1, %p761_p0 }
   0x8   :  { %769 = shalt.err (!%p766_p2)
}
   0x9   :  { %s770_s22 = scalar_lea.vmem %s35_s14, 4096  ;;  %p775_p4 = scmp.lt.s32.totalorder %s35_s14, %s35_s14 }
   0xa   :  { %p771_p3 = scmp.ne.s32.totalorder %s35_s14, %s770_s22  ;;  %p776_p5 = scmp.lt.s32.totalorder %s770_s22, %s770_s22 }
   0xc   :  { %p777_p6 = por %p776_p5, %p775_p4 }
   0xe   :  { %p778_p7 = pnand %p777_p6, %p771_p3 }
  0x10   :  { %781 = shalt.err (!%p778_p7)
}
  0x11   :  { %s855_s23 = smov 128   ;;  %s856_s24 = smov 8  }
  0x12   :  { %40 = dma.hbm_to_vmem [thread:$0]  %s1137_s5, 4096, %s35_s14, [#allocation3], %s855_s23, %s855_s23, %s856_s24  }
  0x13   :  { %848 = dma.done.wait [#allocation3], 4096  }
  0x14   :  { %849 = vsyncadd [#allocation3], 4294963200  ;;  %vm49_vm0 = vcmask 261120   ;;  %v48_v0 = vld [vmem:[%s1132_s0] sm:$0xff]  ;;  %v857_v3 = vmov 0   ;;  %v86_v11 = vld [vmem:[%s1135_s3 + $0x8] sm:$0xff] }
  0x15   :  { %v50_v1 = vsel %vm49_vm0, %v48_v0, 0.0  ;;  %v939_v2 = vld [vmem:[%s1133_s1] sm:$0xff]  ;;  %748 = vset.pattern.permute.xlu1 %v857_v3  ;;  %749 = vset.pattern.permute.xlu0 %v857_v3  ;;  %v858_v13 = vmov 0.0|0.0   ;;  %v87_v14 = vld [vmem:[%s1135_s3 + $0x10] sm:$0xff]  ;;  %v88_v15 = vld [vmem:[%s1135_s3 + $0x18] sm:$0xff]  ;;  %vm859_vm1 = vmmov 0  }
  0x16   :  { %51 = vadd.xlane.f32.xlu0 %v50_v1  ;;  %75 = vperm.xlu1 %748, %v939_v2   ;;  %v70_v4 = vld [vmem:[%s1134_s2] sm:$0xff]  ;;  %v663_v16 = vpack.c.bf16 %v88_v15, %v87_v14  ;;  %v860_v17 = vmov 0.0   ;;  %v163_v18 = vld [vmem:[%s1136_s4 + $0x8] sm:$0xff]  ;;  %v165_v19 = vld [vmem:[%s1136_s4 + $0x18] sm:$0xff]  ;;  %vm178_vm4 = vcmask 523264   ;;  %s861_s28 = smov 64  }
  0x17   :  { %v85_v10 = vld [vmem:[%s1135_s3] sm:$0xff]  ;;  %659 = vmatprep.subr.bf16.mxu0 %v858_v13  ;;  %621 = vmatprep.mubr.msk.f32.mxu0 %vm859_vm1, %v860_v17  ;;  %v665_v21 = vpack.c.bf16 %v165_v19, %v163_v18  ;;  %v164_v22 = vld [vmem:[%s1136_s4 + $0x10] sm:$0xff]  ;;  %v167_v23 = vld [vmem:[%s1136_s4 + $0x28] sm:$0xff]  ;;  %vm387_vm5 = vcmask 0  }
  0x18   :  { %v660_v12 = vpack.c.bf16 %v86_v11, %v85_v10  ;;  %246 = vmatprep.mubr.f32.mxu1 %v860_v17  ;;  %v162_v20 = vld [vmem:[%s1136_s4] sm:$0xff]  ;;  %v169_v24 = vld [vmem:[%s1136_s4 + $0x38] sm:$0xff]  ;;  %v168_v28 = vld [vmem:[%s1136_s4 + $0x30] sm:$0xff] }
  0x19   :  { %v667_v25 = vpack.c.bf16 %v164_v22, %v162_v20  ;;  %v669_v26 = vpack.c.bf16 %v169_v24, %v167_v23  ;;  %v166_v27 = vld [vmem:[%s1136_s4 + $0x20] sm:$0xff]  ;;  %v171_v29 = vld [vmem:[%s1136_s4 + $0x48] sm:$0xff]  ;;  %666 = vmatprep.subr.bf16.mxu1 %v665_v21  ;;  %v173_v30 = vld [vmem:[%s1136_s4 + $0x58] sm:$0xff] }
  0x1a   :  { %81 = vperm.xlu1 %748, %v70_v4   ;;  %661 = vmatpush3.bf16.msra.mxu0 %v660_v12  ;;  %v671_v31 = vpack.c.bf16 %v168_v28, %v166_v27  ;;  %v673_v32 = vpack.c.bf16 %v173_v30, %v171_v29  ;;  %v170_v33 = vld [vmem:[%s1136_s4 + $0x40] sm:$0xff]  ;;  %v172_v34 = vld [vmem:[%s1136_s4 + $0x50] sm:$0xff]  ;;  %v175_v35 = vld [vmem:[%s1136_s4 + $0x68] sm:$0xff] }
  0x1b   :  { %662 = vmatprep.subr.bf16.mxu0 %v858_v13  ;;  %668 = vmatpush1.bf16.msra.mxu1 %v667_v25  ;;  %v177_v36 = vld [vmem:[%s1136_s4 + $0x78] sm:$0xff]  ;;  %v675_v37 = vpack.c.bf16 %v172_v34, %v170_v33  ;;  %v174_v39 = vld [vmem:[%s1136_s4 + $0x60] sm:$0xff]  ;;  %v176_v40 = vld [vmem:[%s1136_s4 + $0x70] sm:$0xff] }
  0x1c   :  { %670 = vmatprep.subr.bf16.mxu1 %v669_v26  ;;  %v677_v38 = vpack.c.bf16 %v177_v36, %v175_v35  ;;  %v679_v41 = vpack.c.bf16 %v176_v40, %v174_v39  ;;  %v287_v56 = vld [vmem:[#allocation2 + $0x80] sm:$0xff]  ;;  %v288_v57 = vld [vmem:[#allocation2 + $0x88] sm:$0xff]  ;;  %v290_v1 = vld [vmem:[#allocation2 + $0x98] sm:$0xff] }
  0x1d   :  { %v271_v58 = vld [vmem:[#allocation2] sm:$0xff]  ;;  %v681_v59 = vpack.c.bf16 %v288_v57, %v287_v56  ;;  %v272_v60 = vld [vmem:[#allocation2 + $0x8] sm:$0xff]  ;;  %v273_v4 = vld [vmem:[#allocation2 + $0x10] sm:$0xff] }
  0x1e   :  { %664 = vmatpush3.bf16.msra.mxu0 %v663_v16  ;;  %v683_v61 = vpack.c.bf16 %v272_v60, %v271_v58  ;;  %v275_v11 = vld [vmem:[#allocation2 + $0x20] sm:$0xff]  ;;  %v276_v12 = vld [vmem:[#allocation2 + $0x28] sm:$0xff]  ;;  %v293_v15 = vld [vmem:[#allocation2 + $0xb0] sm:$0xff] }
  0x1f   :  { %672 = vmatpush1.bf16.msra.mxu1 %v671_v31  ;;  %682 = vmatprep.subr.bf16.mxu0 %v681_v59  ;;  %v691_v14 = vpack.c.bf16 %v276_v12, %v275_v11  ;;  %v294_v16 = vld [vmem:[#allocation2 + $0xb8] sm:$0xff]  ;;  %v295_v21 = vld [vmem:[#allocation2 + $0xc0] sm:$0xff]  ;;  %v296_v22 = vld [vmem:[#allocation2 + $0xc8] sm:$0xff] }
  0x20   :  { %674 = vmatprep.subr.bf16.mxu1 %v673_v32  ;;  %v693_v18 = vpack.c.bf16 %v294_v16, %v293_v15  ;;  %v278_v19 = vld [vmem:[#allocation2 + $0x38] sm:$0xff]  ;;  %v697_v23 = vpack.c.bf16 %v296_v22, %v295_v21  ;;  %v279_v24 = vld [vmem:[#allocation2 + $0x40] sm:$0xff]  ;;  %v280_v25 = vld [vmem:[#allocation2 + $0x48] sm:$0xff] }
  0x21   :  { %v699_v26 = vpack.c.bf16 %v280_v25, %v279_v24  ;;  %v297_v27 = vld [vmem:[#allocation2 + $0xd0] sm:$0xff]  ;;  %v298_v28 = vld [vmem:[#allocation2 + $0xd8] sm:$0xff]  ;;  %v299_v33 = vld [vmem:[#allocation2 + $0xe0] sm:$0xff] }
  0x22   :  { %v701_v29 = vpack.c.bf16 %v298_v28, %v297_v27  ;;  %v281_v30 = vld [vmem:[#allocation2 + $0x50] sm:$0xff]  ;;  %v282_v31 = vld [vmem:[#allocation2 + $0x58] sm:$0xff]  ;;  %v300_v34 = vld [vmem:[#allocation2 + $0xe8] sm:$0xff] }
  0x23   :  { %676 = vmatpush1.bf16.msra.mxu1 %v675_v37  ;;  %v703_v32 = vpack.c.bf16 %v282_v31, %v281_v30  ;;  %v705_v35 = vpack.c.bf16 %v300_v34, %v299_v33  ;;  %v283_v36 = vld [vmem:[#allocation2 + $0x60] sm:$0xff]  ;;  %v284_v37 = vld [vmem:[#allocation2 + $0x68] sm:$0xff]  ;;  %v301_v39 = vld [vmem:[#allocation2 + $0xf0] sm:$0xff]  ;;  %v499_v34 = vadd.f32 1e-10, %v939_v2 }
  0x24   :  { %678 = vmatprep.subr.bf16.mxu1 %v677_v38  ;;  %v707_v38 = vpack.c.bf16 %v284_v37, %v283_v36  ;;  %v302_v40 = vld [vmem:[#allocation2 + $0xf8] sm:$0xff]  ;;  %v411_v56 = vld [vmem:[%s1138_s6 + $0x30] sm:$0xff]  ;;  %v413_v59 = vld [vmem:[%s1138_s6 + $0x40] sm:$0xff] }
  0x25   :  { %v412_v57 = vld [vmem:[%s1138_s6 + $0x38] sm:$0xff]  ;;  %v414_v60 = vld [vmem:[%s1138_s6 + $0x48] sm:$0xff] }
  0x26   :  { %v723_v58 = vpack.c.bf16 %v412_v57, %v411_v56  ;;  %v420_v27 = vld [vmem:[%s1138_s6 + $0x78] sm:$0xff] }
  0x27   :  { %680 = vmatpush1.bf16.msra.mxu1 %v679_v41  ;;  %v709_v41 = vpack.c.bf16 %v302_v40, %v301_v39 }
  0x28   :  { %713 = vmatprep.subr.bf16.mxu1 %v858_v13 }
  0x95   :  { %v76_v50 = vpop.permute.xlu1 %75 }
  0x99   :  { %v1023_v54 = vpop.permute.xlu1 %81 }
  0xa3   :  { %v52_v5 = vpop.xlane.xlu0 %51 }
  0xa4   :  { %v945_v6 = vmul.f32 0.03125, %v52_v5  ;;  %v274_v5 = vld [vmem:[#allocation2 + $0x18] sm:$0xff] }
  0xa6   :  { %v948_v7 = vsub.f32 %v48_v0, %v945_v6  ;;  %v289_v0 = vld [vmem:[#allocation2 + $0x90] sm:$0xff] }
  0xa7   :  { %v685_v3 = vpack.c.bf16 %v290_v1, %v289_v0  ;;  %v417_v1 = vld [vmem:[%s1138_s6 + $0x60] sm:$0xff] }
  0xa8   :  { %v56_v8 = vmul.f32 %v948_v7, %v948_v7 }
  0xaa   :  { %v57_v9 = vsel %vm49_vm0, %v56_v8, 0.0  ;;  %v291_v8 = vld [vmem:[#allocation2 + $0xa0] sm:$0xff] }
  0xab   :  { %58 = vadd.xlane.f32.xlu0 %v57_v9  ;;  %v292_v9 = vld [vmem:[#allocation2 + $0xa8] sm:$0xff] }
  0xac   :  { %v689_v10 = vpack.c.bf16 %v292_v9, %v291_v8 }
 0x138   :  { %v59_v42 = vpop.xlane.xlu0 %58 }
 0x139   :  { %v60_v43 = vmul.f32 0.03125, %v59_v42  ;;  %v285_v42 = vld [vmem:[#allocation2 + $0x70] sm:$0xff] }
 0x13b   :  { %v61_v44 = vadd.f32 1e-05, %v60_v43  ;;  %v286_v43 = vld [vmem:[#allocation2 + $0x78] sm:$0xff] }
 0x13d   :  { %750 = vrsqrt.f32 %v61_v44  ;;  %vm64_vm2 = vcmp.eq.f32.partialorder %v61_v44, inf  ;;  %v67_v47 = vand.u32 2147483648, %v61_v44  ;;  %vm66_vm3 = vcmp.eq.f32.partialorder %v61_v44, 0.0 }
 0x147   :  { %v751_v45 = vpop.eup %750 }
 0x148   :  { %v63_v46 = vmul.f32 %v751_v45, %v61_v44  ;;  %v405_v45 = vld [vmem:[%s1138_s6] sm:$0xff] }
 0x14a   :  { %v65_v48 = vsel %vm64_vm2, %v61_v44, %v63_v46  ;;  %v711_v44 = vpack.c.bf16 %v286_v43, %v285_v42  ;;  %v406_v46 = vld [vmem:[%s1138_s6 + $0x8] sm:$0xff] }
 0x14b   :  { %v1019_v49 = vsel %vm66_vm3, %v67_v47, %v65_v48  ;;  %v407_v47 = vld [vmem:[%s1138_s6 + $0x10] sm:$0xff]  ;;  %v714_v48 = vpack.c.bf16 %v406_v46, %v405_v45 }
 0x14c   :  { %752 = vrcp.f32 %v1019_v49 }
 0x156   :  { %v753_v51 = vpop.eup %752 }
 0x157   :  { %v72_v52 = vmul.f32 %v753_v51, %v948_v7  ;;  %v687_v7 = vpack.c.bf16 %v274_v5, %v273_v4 }
 0x159   :  { %v78_v53 = vmul.f32 %v76_v50, %v72_v52  ;;  %v408_v50 = vld [vmem:[%s1138_s6 + $0x18] sm:$0xff]  ;;  %v409_v52 = vld [vmem:[%s1138_s6 + $0x20] sm:$0xff] }
 0x15a   :  { %v717_v51 = vpack.c.bf16 %v408_v50, %v407_v47 }
 0x15b   :  { %v84_v55 = vadd.f32 %v1023_v54, %v78_v53  ;;  %v410_v53 = vld [vmem:[%s1138_s6 + $0x28] sm:$0xff] }
 0x15d   :  { %622 = vmatmul.mubr.msk.f32.vlgmr.msra.gmra.mrb[0].mxu0 %vm49_vm0, %v84_v55  ;;  %v720_v55 = vpack.c.bf16 %v410_v53, %v409_v52 }
 0x15e   :  { %684 = vmatpush3.bf16.msra.mxu0 %v683_v61  ;;  %v726_v61 = vpack.c.bf16 %v414_v60, %v413_v59 }
 0x15f   :  { %686 = vmatprep.subr.bf16.mxu0 %v685_v3  ;;  %v418_v3 = vld [vmem:[%s1138_s6 + $0x68] sm:$0xff] }
 0x160   :  { %v732_v4 = vpack.c.bf16 %v418_v3, %v417_v1 }
 0x162   :  { %688 = vmatpush3.bf16.msra.mxu0 %v687_v7 }
 0x163   :  { %690 = vmatprep.subr.bf16.mxu0 %v689_v10 }
 0x166   :  { %692 = vmatpush3.bf16.msra.mxu0 %v691_v14 }
 0x167   :  { %694 = vmatprep.subr.bf16.mxu0 %v693_v18 }
 0x230   :  { %v158_v62 = vpop.f32.mrb[0].mxu0 }
 0x231   :  { %v623_v63 = vpop.f32.mrb[1].mxu0  ;;  %554 = vmatmul.mubr.msk.f32.vlgmr.msra.gmra.mrb[0].mxu1 %vm178_vm4, %v158_v62  ;;  %v415_v62 = vld [vmem:[%s1138_s6 + $0x50] sm:$0xff] }
 0x232   :  { %656 = vmatprep.mubr.msk.f32.mxu1 %vm859_vm1, %v860_v17  ;;  %v277_v17 = vld [vmem:[#allocation2 + $0x30] sm:$0xff]  ;;  %715 = vmatpush3.bf16.msra.mxu1 %v714_v48  ;;  %v416_v63 = vld [vmem:[%s1138_s6 + $0x58] sm:$0xff] }
 0x233   :  { %v695_v20 = vpack.c.bf16 %v278_v19, %v277_v17  ;;  %716 = vmatprep.subr.bf16.mxu1 %v858_v13  ;;  %v729_v0 = vpack.c.bf16 %v416_v63, %v415_v62 }
 0x235   :  { %696 = vmatpush3.bf16.msra.mxu0 %v695_v20 }
 0x236   :  { %698 = vmatprep.subr.bf16.mxu0 %v697_v23  ;;  %718 = vmatpush3.bf16.msra.mxu1 %v717_v51 }
 0x237   :  { %719 = vmatprep.subr.bf16.mxu1 %v858_v13 }
 0x239   :  { %700 = vmatpush3.bf16.msra.mxu0 %v699_v26  ;;  %v419_v26 = vld [vmem:[%s1138_s6 + $0x70] sm:$0xff]  ;;  %s862_s6 = smov [#allocation6]  }
 0x23a   :  { %702 = vmatprep.subr.bf16.mxu0 %v701_v29  ;;  %721 = vmatpush3.bf16.msra.mxu1 %v720_v55  ;;  %v735_v28 = vpack.c.bf16 %v420_v27, %v419_v26  ;;  %s527_s29 = sshll.u32 %s862_s6, 4  ;;  %s528_s29 = int_to_ptr.vmem [resolvable:$true] %s527_s29 }
 0x23b   :  { %722 = vmatprep.subr.bf16.mxu1 %v858_v13  ;;  %s782_s30 = scalar_lea.vmem %s528_s29, 16  ;;  %s786_s5 = scalar_lea.vmem %s528_s29, 32 }
 0x23c   :  { %p783_p8 = scmp.ne.s32.totalorder %s528_s29, %s782_s30  ;;  %p787_p9 = scmp.lt.s32.totalorder %s528_s29, %s528_s29 }
 0x23d   :  { %704 = vmatpush3.bf16.msra.mxu0 %v703_v32  ;;  %p788_p10 = scmp.lt.s32.totalorder %s786_s5, %s782_s30 }
 0x23e   :  { %706 = vmatprep.subr.bf16.mxu0 %v705_v35  ;;  %724 = vmatpush3.bf16.msra.mxu1 %v723_v58 }
 0x23f   :  { %725 = vmatprep.subr.bf16.mxu1 %v858_v13  ;;  %p789_p11 = por %p788_p10, %p787_p9 }
 0x241   :  { %708 = vmatpush3.bf16.msra.mxu0 %v707_v38  ;;  %p790_p12 = pnand %p789_p11, %p783_p8 }
 0x242   :  { %710 = vmatprep.subr.bf16.mxu0 %v709_v41  ;;  %727 = vmatpush3.bf16.msra.mxu1 %v726_v61 }
 0x243   :  { %728 = vmatprep.subr.bf16.mxu1 %v858_v13 }
 0x245   :  { %712 = vmatpush3.bf16.msra.mxu0 %v711_v44 }
 0x246   :  { %730 = vmatpush3.bf16.msra.mxu1 %v729_v0 }
 0x247   :  { %731 = vmatprep.subr.bf16.mxu1 %v858_v13 }
 0x24a   :  { %733 = vmatpush3.bf16.msra.mxu1 %v732_v4 }
 0x24b   :  { %734 = vmatprep.subr.bf16.mxu1 %v858_v13 }
 0x24e   :  { %736 = vmatpush3.bf16.msra.mxu1 %v735_v28 }
 0x304   :  { %v248_v5 = vpop.f32.mrb[0].mxu1 }
 0x305   :  { %v253_v7 = vmul.f32 %v248_v5, %v248_v5  ;;  %v250_v8 = vpop.f32.mrb[1].mxu1 }
 0x306   :  { %v254_v9 = vmul.f32 %v250_v8, %v250_v8 }
 0x307   :  { %v255_v10 = vmul.f32 %v253_v7, %v248_v5 }
 0x308   :  { %v256_v11 = vmul.f32 %v254_v9, %v250_v8 }
 0x309   :  { %v257_v12 = vmul.f32 0.044715, %v255_v10 }
 0x30a   :  { %v258_v14 = vmul.f32 0.044715, %v256_v11 }
 0x30b   :  { %v259_v15 = vadd.f32 %v257_v12, %v248_v5 }
 0x30c   :  { %v260_v16 = vadd.f32 %v258_v14, %v250_v8 }
 0x30d   :  { %v261_v18 = vmul.f32 0.7978846, %v259_v15 }
 0x30e   :  { %v262_v17 = vmul.f32 0.7978846, %v260_v16 }
 0x30f   :  { %754 = vtanh.f32 %v261_v18 }
 0x310   :  { %756 = vtanh.f32 %v262_v17 }
 0x319   :  { %v755_v19 = vpop.eup %754 }
 0x31a   :  { %v757_v20 = vpop.eup %756  ;;  %v265_v21 = vadd.f32 1.0, %v755_v19 }
 0x31b   :  { %v266_v22 = vadd.f32 1.0, %v757_v20 }
 0x31c   :  { %v267_v23 = vmul.f32 0.5, %v265_v21 }
 0x31d   :  { %v268_v13 = vmul.f32 0.5, %v266_v22 }
 0x31e   :  { %v269_v25 = vmul.f32 %v267_v23, %v248_v5 }
 0x31f   :  { %v270_v24 = vmul.f32 %v268_v13, %v250_v8 }
 0x321   :  { %367 = vmatprep.mubr.f32.mxu0 %v270_v24 }
 0x322   :  { %368 = vmatmul.mubr.f32.vlgmr.msra.gmra.mrb[2].mxu0 %v269_v25 }
 0x3f5   :  { %v593_v29 = vpop.f32.mrb[2].mxu0 }
 0x3f6   :  { %v594_v30 = vpop.f32.mrb[3].mxu0 }
 0x3f7   :  { %v595_v31 = vadd.f32 %v594_v30, %v593_v29 }
 0x3f9   :  { %v373_v32 = vmul.f32 %v595_v31, %v595_v31  ;;  %657 = vmatmul.mubr.f32.vlgmr.msra.gmra.mrb[2].mxu1 %v595_v31 }
 0x3fb   :  { %390 = vrot.lane.b32.xlu0 %v373_v32, %s861_s28  ;;  %v374_v33 = vsel %vm178_vm4, %v373_v32, 0.0 }
 0x3fc   :  { %375 = vadd.xlane.f32.xlu1 %v374_v33 }
 0x40d   :  { %502 = vperm.xlu1 %748, %v499_v34  }
 0x46d   :  { %v391_v35 = vpop.permute.xlu0 %390 }
 0x46e   :  { %v393_v36 = vsel %vm178_vm4, %v391_v35, 0.0 }
 0x46f   :  { %394 = vadd.xlane.f32.xlu0 %v393_v36 }
 0x489   :  { %v376_v37 = vpop.xlane.xlu1 %375 }
 0x48a   :  { %v378_v38 = vmul.f32 0.015625, %v376_v37 }
 0x48c   :  { %v379_v39 = vrot.slane %v378_v38, 4 }
 0x48e   :  { %v380_v40 = vadd.f32 %v379_v39, %v378_v38 }
 0x490   :  { %v381_v41 = vrot.slane %v380_v40, 2 }
 0x492   :  { %v382_v42 = vadd.f32 %v381_v41, %v380_v40 }
 0x494   :  { %v383_v43 = vrot.slane %v382_v42, 1 }
 0x496   :  { %v384_v44 = vadd.f32 %v383_v43, %v382_v42 }
 0x498   :  { %v386_v45 = vmul.f32 0.125, %v384_v44 }
 0x49a   :  { %388 = vst.msk [vmem:[#allocation6] sm:$0x1] %vm387_vm5, %v386_v45 }
 0x49b   :  { %793 = shalt.err (!%p790_p12)
}
 0x49c   :  { %s794_s1 = scalar_lea.hbm %s1141_s9, 16 }
 0x49d   :  { %p795_p13 = scmp.ne.s32.totalorder %s1141_s9, %s794_s1  ;;  %p798_p0 = scmp.lt.u32.totalorder %s794_s1, %s1141_s9 }
 0x49f   :  { %p800_p1 = pnand %p798_p0, %p795_p13 }
 0x4a1   :  { %803 = shalt.err (!%p800_p1)
}
 0x4a2   :  { %530 = dma.vmem_to_hbm [thread:$0]  %s528_s29, 16, %s1141_s9, [#allocation7]   ;;  %v503_v2 = vpop.permute.xlu1 %502  ;;  %v555_v46 = vld [vmem:[%s1139_s7] ss:$0 sm:$0xff]  ;;  %vm509_vm6 = vcmask 130048  }
 0x4a3   :  { %758 = vrcp.f32 %v503_v2  ;;  %s863_s19 = smov [#allocation5]  }
 0x4a4   :  { %s517_s20 = sshll.u32 %s863_s19, 4  ;;  %s518_s20 = int_to_ptr.vmem [resolvable:$true] %s517_s20 }
 0x4a5   :  { %s804_s9 = scalar_lea.vmem %s518_s20, 128  ;;  %p809_p3 = scmp.lt.s32.totalorder %s518_s20, %s518_s20 }
 0x4a6   :  { %p805_p2 = scmp.ne.s32.totalorder %s518_s20, %s804_s9  ;;  %p810_p4 = scmp.lt.s32.totalorder %s804_s9, %s804_s9 }
 0x4a8   :  { %p811_p5 = por %p810_p4, %p809_p3 }
 0x4aa   :  { %p812_p6 = pnand %p811_p5, %p805_p2 }
 0x4ad   :  { %v759_v52 = vpop.eup %758 }
 0x4cc   :  { %v494_v47 = vpop.f32.mrb[2].mxu1 }
 0x4cd   :  { %v495_v48 = vadd.f32 %v555_v46, %v494_v47  ;;  %v658_v50 = vpop.f32.mrb[3].mxu1 }
 0x4cf   :  { %v498_v51 = vsub.f32 %v495_v48, %v1023_v54 }
 0x4d1   :  { %v506_v53 = vmul.f32 %v759_v52, %v498_v51 }
 0x4d3   :  { %v507_v55 = vmul.f32 %v506_v53, %v1019_v49 }
 0x4d5   :  { %v508_v56 = vadd.f32 %v507_v55, %v945_v6 }
 0x4d7   :  { %510 = vst.msk [vmem:[#allocation5] sm:$0xff] %vm509_vm6, %v508_v56 }
 0x4d8   :  { %815 = shalt.err (!%p812_p6)
}
 0x4d9   :  { %s816_s22 = scalar_lea.hbm %s1140_s8, 128 }
 0x4da   :  { %p817_p7 = scmp.ne.s32.totalorder %s1140_s8, %s816_s22  ;;  %p820_p8 = scmp.lt.u32.totalorder %s816_s22, %s1140_s8 }
 0x4dc   :  { %p822_p9 = pnand %p820_p8, %p817_p7 }
 0x4de   :  { %825 = shalt.err (!%p822_p9)
}
 0x4df   :  { %520 = dma.vmem_to_hbm [thread:$0]  %s518_s20, 128, %s1140_s8, [#allocation4]  }
 0x4e0   :  { %s864_s27 = smov [#allocation8]  }
 0x4e1   :  { %s537_s28 = sshll.u32 %s864_s27, 4  ;;  %s538_s28 = int_to_ptr.vmem [resolvable:$true] %s537_s28 }
 0x4e2   :  { %s826_s6 = scalar_lea.vmem %s538_s28, 16  ;;  %s830_s29 = scalar_lea.vmem %s538_s28, 32 }
 0x4e3   :  { %p827_p10 = scmp.ne.s32.totalorder %s538_s28, %s826_s6  ;;  %p831_p11 = scmp.lt.s32.totalorder %s538_s28, %s538_s28 }
 0x4e4   :  { %p832_p12 = scmp.lt.s32.totalorder %s830_s29, %s826_s6 }
 0x4e6   :  { %p833_p13 = por %p832_p12, %p831_p11 }
 0x4e8   :  { %p834_p0 = pnand %p833_p13, %p827_p10 }
 0x4fc   :  { %v395_v6 = vpop.xlane.xlu0 %394 }
 0x4fd   :  { %v396_v49 = vmul.f32 0.015625, %v395_v6 }
 0x4ff   :  { %v397_v54 = vrot.slane %v396_v49, 4 }
 0x501   :  { %v398_v57 = vadd.f32 %v397_v54, %v396_v49 }
 0x503   :  { %v399_v58 = vrot.slane %v398_v57, 2 }
 0x505   :  { %v400_v59 = vadd.f32 %v399_v58, %v398_v57 }
 0x507   :  { %v401_v60 = vrot.slane %v400_v59, 1 }
 0x509   :  { %v402_v61 = vadd.f32 %v401_v60, %v400_v59 }
 0x50b   :  { %v403_v62 = vmul.f32 0.125, %v402_v61 }
 0x50d   :  { %404 = vst.msk [vmem:[#allocation8] sm:$0x1] %vm387_vm5, %v403_v62 }
 0x50e   :  { %837 = shalt.err (!%p834_p0)
}
 0x50f   :  { %s838_s5 = scalar_lea.hbm %s1142_s10, 16 }
 0x510   :  { %p839_p1 = scmp.ne.s32.totalorder %s1142_s10, %s838_s5  ;;  %p842_p2 = scmp.lt.u32.totalorder %s838_s5, %s1142_s10 }
 0x512   :  { %p844_p3 = pnand %p842_p2, %p839_p1 }
 0x514   :  { %847 = shalt.err (!%p844_p3)
}
 0x515   :  { %540 = dma.vmem_to_hbm [thread:$0]  %s538_s28, 16, %s1142_s10, [#allocation7]  }
 0x516   :  { %850 = dma.done.wait [#allocation4], 128  }
 0x517   :  { %851 = vsyncadd [#allocation4], 4294967168 }
 0x518   :  { %852 = dma.done.wait [#allocation7], 32  }
 0x519   :  { %853 = vsyncadd [#allocation7], 4294967264 }
 0x51a   :  { %550 = vsyncpa [#allocation3], 1 }
 0x51b   :  { %551 = vsyncpa [#allocation4], 1 }
 0x51c   :  { %552 = vsyncpa [#allocation7], 1 }

</bundles_post_ra>
